<compile_context>
chip_gen: v7x
topology: tpu7x:2x2x1
jax: 0.10.0
libtpu: 0.0.40
codegen_flags: <defaults>
</compile_context>

<pallas_src>
import jax
import jax.numpy as jnp
from jax.experimental import pallas as pl
from jax.experimental.pallas import tpu as pltpu

_LANE = 128


def _round_up(v, m):
    return ((v + m - 1) // m) * m


def _mixed_skip_kernel(alpha_ref, x_ref, s_ref, gw_ref, gb_ref, o_ref):
    # alpha_ref: SMEM (3,) f32 -- already-softmaxed architecture weights.
    a0 = alpha_ref[0]
    a1 = alpha_ref[1]
    a2 = alpha_ref[2]
    asum = a0 + a1 + a2  # == 1 up to fp rounding; kept explicit for exactness

    x = x_ref[0]  # (C, TS)
    s = s_ref[0]  # (C, TS)

    # gate = sigmoid(Conv2d_1x1(skip)) on NCHW data:
    #   (C_out, C_in) @ (C_in, spatial) -> lane-dense (C, TS) output.
    # Matmul runs in the weight's dtype (bf16 at large C), accumulates in f32.
    logits = jnp.dot(gw_ref[...], s.astype(gw_ref.dtype),
                     preferred_element_type=jnp.float32) + gb_ref[...]
    gate = jax.nn.sigmoid(logits)

    # a0*x + a1*(x+s) + a2*(x + s*gate)  ==  (a0+a1+a2)*x + s*(a1 + a2*gate)
    # (accumulation order differs from the PyTorch reference; agrees to ~1e-5)
    o_ref[0] = (asum * x + s * (a1 + a2 * gate)).astype(o_ref.dtype)


def mixed_skip_connection(x, skip_input, raw_weights, gate_w, gate_b, *,
                          tile_byte_target=2 << 20, vmem_limit_bytes=None):
    """x, skip_input: NCHW float32; raw_weights: (3,); gate_w: (C, C, 1, 1); gate_b: (C,)."""
    assert x.shape == skip_input.shape, "only the same-shape path is implemented"
    N, C, H, W = x.shape
    S = H * W

    # Free layout change: NCHW -> (N, C, S). No transpose, no extra HBM pass,
    # and no padding -- the ragged spatial tail is handled inside the kernel.
    x3 = x.reshape(N, C, S)
    s3 = skip_input.reshape(N, C, S)

    # ---- Per-generation VMEM budget (v5e/v6e: 128 MiB, v7x: 64 MiB) --------
    try:
        vmem_cap = int(pltpu.get_tpu_info().vmem_capacity_bytes)
    except Exception:
        vmem_cap = 64 * 1024 * 1024                      # v7x-safe fallback
    if vmem_limit_bytes is None:
        vmem_limit_bytes = (vmem_cap * 3) // 4           # 48 MiB / 96 MiB scoped limit
    vmem_limit_bytes = int(vmem_limit_bytes)

    # Large C: bf16 weight for the gate matmul, single-buffer the grid-invariant
    # (C, C) weight to reclaim its second VMEM buffer (matters on v7x's 64 MiB).
    gw_dtype = jnp.bfloat16 if C >= 512 else jnp.float32
    single_buffer_w = C >= 256
    n_wbuf = 1 if single_buffer_w else 2
    # TODO(synk): for C >= ~2048, additionally tile C_out of the gate weight.

    itemsize = 4  # streams/temporaries are f32 (conservative for narrower inputs)
    weight_bytes = n_wbuf * C * C * jnp.dtype(gw_dtype).itemsize + 2 * C * itemsize
    # VMEM per spatial lane of a tile:
    #   x, skip, out streams double-buffered (3*2) + logits & gate temporaries (2).
    bytes_per_lane = (3 * 2 + 2) * C * itemsize
    headroom = 8 * 1024 * 1024
    tile_budget = max(2 * 1024 * 1024, vmem_limit_bytes - weight_bytes - headroom)
    ts_vmem = max(_LANE, (tile_budget // bytes_per_lane) // _LANE * _LANE)

    # Byte-targeted tile (amortizes ~0.35 us/grid-step overhead at small C);
    # never larger than the lane-rounded spatial extent.
    ts_bytes = max(_LANE, (tile_byte_target // (C * itemsize)) // _LANE * _LANE)
    ts = min(ts_bytes, ts_vmem, _round_up(S, _LANE))

    # v7x megacore: keep at least 2 parallel grid steps so both TCs get work.
    if N * pl.cdiv(S, ts) < 2 and S > _LANE:
        ts = min(ts, _round_up((S + 1) // 2, _LANE))

    n_sp = pl.cdiv(S, ts)  # ragged tail masked by Pallas (no pad, no slice-back)

    # Parameter prep (not the hot path).
    alphas = jax.nn.softmax(raw_weights.astype(jnp.float32), axis=0)
    gw = gate_w[:, :, 0, 0].astype(gw_dtype)             # (C_out, C_in) -- no transpose needed
    gb = gate_b.reshape(C, 1).astype(jnp.float32)

    w_kwargs = {"pipeline_mode": pl.Buffered(1)} if single_buffer_w else {}
    # TODO(synk): if S is too small to reach the byte target, sweep
    # pipeline_mode=pl.Buffered(3) on the x/skip specs when VMEM headroom allows.

    out = pl.pallas_call(
        _mixed_skip_kernel,
        out_shape=jax.ShapeDtypeStruct((N, C, S), x.dtype),
        grid_spec=pltpu.PrefetchScalarGridSpec(
            num_scalar_prefetch=0,
            grid=(N, n_sp),
            in_specs=[
                pl.BlockSpec(memory_space=pltpu.MemorySpace.SMEM),      # softmaxed alphas (3,)
                pl.BlockSpec((1, C, ts), lambda n, j: (n, 0, j)),       # x block
                pl.BlockSpec((1, C, ts), lambda n, j: (n, 0, j)),       # skip block
                pl.BlockSpec((C, C), lambda n, j: (0, 0), **w_kwargs),  # gate conv weight
                pl.BlockSpec((C, 1), lambda n, j: (0, 0)),              # gate conv bias (C, 1)
            ],
            out_specs=pl.BlockSpec((1, C, ts), lambda n, j: (n, 0, j)),
        ),
        compiler_params=pltpu.CompilerParams(
            dimension_semantics=("parallel", "parallel"),
            vmem_limit_bytes=vmem_limit_bytes,
        ),
    )(alphas, x3, s3, gw, gb)

    return out.reshape(N, C, H, W)


def _reference(x, skip_input, raw_weights, gate_w, gate_b):
    """Pure-JAX reference mirroring the PyTorch forward (same-shape path)."""
    alphas = jax.nn.softmax(raw_weights.astype(jnp.float32), axis=0)
    logits = jnp.einsum("oi,nihw->nohw", gate_w[:, :, 0, 0], skip_input) + gate_b[None, :, None, None]
    gate = jax.nn.sigmoid(logits)
    result = alphas[0] * x
    result = result + alphas[1] * (x + skip_input)
    result = result + alphas[2] * (x + skip_input * gate)
    return result


def _run_case(key, N, C, H, W):
    k_x, k_s, k_w, k_gw, k_gb = jax.random.split(key, 5)
    x = jax.random.normal(k_x, (N, C, H, W), dtype=jnp.float32)
    skip = jax.random.normal(k_s, (N, C, H, W), dtype=jnp.float32)
    raw_weights = jax.random.normal(k_w, (3,), dtype=jnp.float32)            # nn.Parameter(torch.randn(3))
    gate_w = jax.random.normal(k_gw, (C, C, 1, 1), dtype=jnp.float32) * 0.1  # Conv2d(C, C, 1).weight
    gate_b = jax.random.normal(k_gb, (C,), dtype=jnp.float32) * 0.1          # Conv2d(C, C, 1).bias

    out = mixed_skip_connection(x, skip, raw_weights, gate_w, gate_b)
    out = jax.block_until_ready(out)

    ref = _reference(x, skip, raw_weights, gate_w, gate_b)
    assert out.shape == (N, C, H, W)
    assert jnp.allclose(out, ref, atol=1e-5, rtol=1e-5), "mismatch vs reference"


if __name__ == "__main__":
    key = jax.random.PRNGKey(0)
    k0, k1, k2 = jax.random.split(key, 3)

    # Primary case: spatial (256) lane-aligned, single full tile per image.
    _run_case(k0, N=2, C=8, H=16, W=16)
    # Non-lane-aligned spatial (100): single partial (masked) block, no padding.
    _run_case(k1, N=2, C=8, H=10, W=10)
    # N=1, spatial 300: exercises the megacore tile split (grid (1,2)) plus a
    # ragged final spatial tile handled by Pallas masking.
    _run_case(k2, N=1, C=8, H=12, W=25)

    print("KERNEL_OK")
</pallas_src>

<mosaic_0001>
module attributes {stable_mosaic.version = 11 : i64} {
  func.func @_mixed_skip_kernel(%arg0: i32, %arg1: i32, %arg2: memref<3xf32, #tpu.memory_space<smem>>, %arg3: memref<1x8x256xf32, #tpu.memory_space<vmem>>, %arg4: memref<1x8x256xf32, #tpu.memory_space<vmem>>, %arg5: memref<8x8xf32, #tpu.memory_space<vmem>>, %arg6: memref<8x1xf32, #tpu.memory_space<vmem>>, %arg7: memref<1x8x256xf32, #tpu.memory_space<vmem>>) attributes {dimension_semantics = [#tpu.dimension_semantics<parallel>, #tpu.dimension_semantics<parallel>], iteration_bounds = array<i64: 2, 1>, scalar_prefetch = 0 : i64, scratch_operands = 0 : i64, tpu.core_type = #tpu.core_type<tc>, window_params = [{transform_indices = @transform_0, window_bounds = array<i64: 3>}, {transform_indices = @transform_1, window_bounds = array<i64: 1, 8, 256>}, {transform_indices = @transform_2, window_bounds = array<i64: 1, 8, 256>}, {pipeline_mode = #tpu.pipeline_mode<synchronous>, transform_indices = @transform_3, window_bounds = array<i64: 8, 8>}, {pipeline_mode = #tpu.pipeline_mode<synchronous>, transform_indices = @transform_4, window_bounds = array<i64: 8, 1>}, {transform_indices = @transform_5, window_bounds = array<i64: 1, 8, 256>}]} {
    %c0 = arith.constant 0 : index
    %0 = memref.load %arg2[%c0] : memref<3xf32, #tpu.memory_space<smem>>
    %c1 = arith.constant 1 : index
    %1 = memref.load %arg2[%c1] : memref<3xf32, #tpu.memory_space<smem>>
    %c2 = arith.constant 2 : index
    %2 = memref.load %arg2[%c2] : memref<3xf32, #tpu.memory_space<smem>>
    %3 = arith.addf %0, %1 : f32
    %4 = arith.addf %3, %2 : f32
    %c0_0 = arith.constant 0 : index
    %c0_1 = arith.constant 0 : index
    %c0_2 = arith.constant 0 : index
    %5 = vector.load %arg3[%c0_0, %c0_1, %c0_2] : memref<1x8x256xf32, #tpu.memory_space<vmem>>, vector<1x8x256xf32>
    %6 = vector.shape_cast %5 : vector<1x8x256xf32> to vector<8x256xf32>
    %c0_3 = arith.constant 0 : index
    %c0_4 = arith.constant 0 : index
    %c0_5 = arith.constant 0 : index
    %7 = vector.load %arg4[%c0_3, %c0_4, %c0_5] : memref<1x8x256xf32, #tpu.memory_space<vmem>>, vector<1x8x256xf32>
    %8 = vector.shape_cast %7 : vector<1x8x256xf32> to vector<8x256xf32>
    %c0_6 = arith.constant 0 : index
    %c0_7 = arith.constant 0 : index
    %9 = vector.load %arg5[%c0_6, %c0_7] : memref<8x8xf32, #tpu.memory_space<vmem>>, vector<8x8xf32>
    %cst = arith.constant dense<0.000000e+00> : vector<8x256xf32>
    %10 = tpu.matmul %9, %8, %cst {dimension_numbers = #tpu.dot_dimension_numbers<[1], [0], [0], [1], [0, 0, 1, 1], [], []>} : vector<8x8xf32>, vector<8x256xf32>, vector<8x256xf32> -> vector<8x256xf32>
    %c0_8 = arith.constant 0 : index
    %c0_9 = arith.constant 0 : index
    %11 = vector.load %arg6[%c0_8, %c0_9] : memref<8x1xf32, #tpu.memory_space<vmem>>, vector<8x1xf32>
    %12 = vector.broadcast %11 : vector<8x1xf32> to vector<8x256xf32>
    %13 = arith.addf %10, %12 : vector<8x256xf32>
    %14 = arith.negf %13 : vector<8x256xf32>
    %15 = math.exp %14 : vector<8x256xf32>
    %cst_10 = arith.constant 1.000000e+00 : f32
    %16 = vector.broadcast %cst_10 : f32 to vector<8x256xf32>
    %17 = arith.addf %16, %15 : vector<8x256xf32>
    %18 = arith.divf %16, %17 : vector<8x256xf32>
    %19 = vector.broadcast %4 : f32 to vector<8x256xf32>
    %20 = arith.mulf %19, %6 : vector<8x256xf32>
    %21 = vector.broadcast %2 : f32 to vector<8x256xf32>
    %22 = arith.mulf %21, %18 : vector<8x256xf32>
    %23 = vector.broadcast %1 : f32 to vector<8x256xf32>
    %24 = arith.addf %23, %22 : vector<8x256xf32>
    %25 = arith.mulf %8, %24 : vector<8x256xf32>
    %26 = arith.addf %20, %25 : vector<8x256xf32>
    %c0_11 = arith.constant 0 : index
    %c0_12 = arith.constant 0 : index
    %c0_13 = arith.constant 0 : index
    %27 = vector.load %arg7[%c0_11, %c0_12, %c0_13] : memref<1x8x256xf32, #tpu.memory_space<vmem>>, vector<1x8x256xf32>
    %28 = vector.shape_cast %27 : vector<1x8x256xf32> to vector<8x256xf32>
    %29 = vector.shape_cast %26 : vector<8x256xf32> to vector<1x8x256xf32>
    tpu.vector_store %arg7[%c0_11, %c0_12, %c0_13], %29 {strides = array<i32>} : memref<1x8x256xf32, #tpu.memory_space<vmem>>, vector<1x8x256xf32>,
    return
  }
  func.func @transform_0(%arg0: i32, %arg1: i32) -> i32 {
    %c0_i32 = arith.constant 0 : i32
    %c0_i32_0 = arith.constant 0 : i32
    return %c0_i32 : i32
  }
  func.func @transform_1(%arg0: i32, %arg1: i32) -> (i32, i32, i32) {
    %c0_i32 = arith.constant 0 : i32
    %c0_i32_0 = arith.constant 0 : i32
    return %arg0, %c0_i32, %arg1 : i32, i32, i32
  }
  func.func @transform_2(%arg0: i32, %arg1: i32) -> (i32, i32, i32) {
    %c0_i32 = arith.constant 0 : i32
    %c0_i32_0 = arith.constant 0 : i32
    return %arg0, %c0_i32, %arg1 : i32, i32, i32
  }
  func.func @transform_3(%arg0: i32, %arg1: i32) -> (i32, i32) {
    %c0_i32 = arith.constant 0 : i32
    %c0_i32_0 = arith.constant 0 : i32
    %c0_i32_1 = arith.constant 0 : i32
    return %c0_i32, %c0_i32_0 : i32, i32
  }
  func.func @transform_4(%arg0: i32, %arg1: i32) -> (i32, i32) {
    %c0_i32 = arith.constant 0 : i32
    %c0_i32_0 = arith.constant 0 : i32
    %c0_i32_1 = arith.constant 0 : i32
    return %c0_i32, %c0_i32_0 : i32, i32
  }
  func.func @transform_5(%arg0: i32, %arg1: i32) -> (i32, i32, i32) {
    %c0_i32 = arith.constant 0 : i32
    %c0_i32_0 = arith.constant 0 : i32
    return %arg0, %c0_i32, %arg1 : i32, i32, i32
  }
}

</mosaic_0001>

<bundles_post_ra>
// kernel: tpu_custom_call.1
= control target key start
LH: loop header
LB: loop body
LE: loop exit
PB: predicated region body
PF: predicated region fallthrough
CT: control target
= control target key end

     0   :  { %s1148_s0 = inlined_call_operand.vmem [shape: f32[3], index: 0, kind: input, shape index: {}]   ;;  %s1149_s1 = inlined_call_operand.hbm [shape: f32[2,8,256], index: 1, kind: input, shape index: {}]   ;;  %s1150_s2 = inlined_call_operand.hbm [shape: f32[2,8,256], index: 2, kind: input, shape index: {}]   ;;  %s1151_s3 = inlined_call_operand.vmem [shape: f32[8,8], index: 3, kind: input, shape index: {}]   ;;  %s1152_s4 = inlined_call_operand.vmem [shape: f32[8,1], index: 4, kind: input, shape index: {}]   ;;  %s1153_s5 = inlined_call_operand.hbm [shape: f32[2,8,256], index: 5, kind: output, shape index: {}]  }
   0x1   :  { %1162 = sst [smem:[#allocation16_spill]] %s1148_s0 }
   0x2   :  { %1163 = sst [smem:[#allocation17_spill]] %s1149_s1 }
   0x3   :  { %10 = vsyncpa [#allocation5], 0 }
   0x4   :  { %11 = vsyncpa [#allocation3], 0 }
   0x5   :  { %13 = vsyncpa [#allocation3 + $0x1], 0 }
   0x6   :  { %14 = vsyncpa [#allocation8], 0 }
   0x7   :  { %16 = vsyncpa [#allocation8 + $0x1], 0 }
   0x8   :  { %17 = vsyncpa [#allocation4], 0 }
   0x9   :  { %19 = vsyncpa [#allocation4 + $0x1], 0  ;;  %s896_s18 = smov 0   ;;  %s898_s19 = smov 0  }
   0xa   :  { %s900_s20 = smov 0   ;;  %s902_s21 = smov 0  }
   0xb   :  { %s904_s22 = smov 0   ;;  %s906_s23 = smov 0  }
   0xc LB: > { %1164 = sst [smem:[#allocation14_spill]] %s854_s22  ;;  %s575_s24 = sadd.s32 4294967295, %s858_s23   ;;  %s858_s23 = sphi %s906_s23, %s25_s23   ;;  %s854_s22 = sphi %s904_s22, %s1184_s22   ;;  %s850_s21 = sphi %s902_s21, %s1183_s21   ;;  %s846_s20 = sphi %s900_s20, %s1187_s20   ;;  %s842_s19 = sphi %s898_s19, %s1186_s19   ;;  %s838_s18 = sphi %s896_s18, %s1185_s18  }
   0xd   : > { %s576_s25 = sadd.s32 4294967294, %s858_s23   ;;  %p80_p0 = scmp.ne.s32.totalorder %s842_s19, %s838_s18 }
   0xe   : > { %p930_p1 = scmp.eq.s32.totalorder %s575_s24, 0  ;;  %p934_p2 = scmp.eq.s32.totalorder %s575_s24, 1 }
   0xf   : > { %p182_p3 = scmp.eq.s32.totalorder %s576_s25, 1  ;;  %p577_p5 = scmp.ge.s32.totalorder %s858_s23, 1 }
  0x10   : > { %s1165_s26 = scalar_select %p930_p1, 1, 0 }
  0x11   : > { %p940_p4 = por %p930_p1, %p80_p0  ;;  %p945_p6 = por %p182_p3, %p80_p0 }
  0x12   : > { %p189_p7 = scmp.lt.s32.totalorder %s858_s23, 3  ;;  %s1169_s0 = sld [smem:[#allocation16_spill]] }
  0x13   : > { %s1167_s28 = scalar_select %p940_p4, 1, 0 }
  0x14   : > { %s1168_s29 = scalar_select %p945_p6, 1, 0 }
  0x15   : > { %p953_p8 = pnand %p577_p5, %p189_p7  ;;  %s37_s10 = sadd.s32 1, %s854_s22 }
  0x16   : > { %s67_s11 = sadd.s32 1, %s846_s20  ;;  %p39_p12 = scmp.ge.s32.totalorder %s37_s10, 2 }
  0x17   : > { %s1170_s8 = scalar_select %p953_p8, 1, 0 }
  0x18   : > { %s202_s7 = sshll.u32 %s1169_s0, 4  ;;  %p614_p10 = pneg %p953_p8  ;;  %s203_s7 = int_to_ptr.vmem [resolvable:$true] %s202_s7 }
  0x19   : > { %s693_s12 = scalar_lea.vmem %s203_s7, 16  ;;  %p701_p7 = scmp.lt.s32.totalorder %s203_s7, %s203_s7 }
  0x1a   : > { %p962_p11 = pnand %p614_p10, %p930_p1  ;;  %p694_p13 = scmp.ne.s32.totalorder %s203_s7, %s693_s12 }
  0x1b   : > { %p702_p6 = scmp.lt.s32.totalorder %s693_s12, %s693_s12 }
  0x1c   : > { %p695_p0 = pneg %p962_p11 }
  0x1d   : > { %p703_p9 = por %p702_p6, %p701_p7 }
  0x1e   : > { %p696_p3 = pnand %p695_p0, %p694_p13 }
  0x20   : > { %p697_p5 = pneg %p696_p3 }
  0x22   : > { %p704_p4 = pnand %p703_p9, %p697_p5 }
  0x24   : > { %707 = shalt.err (!%p704_p4)
}
  0x25   : > { %s860_s13 = smov [#allocation2]   ;;  %s1189_s10 = smov (%p39_p12, %s37_s10), 0 }
  0x26   : > { %617 = dma.vmem_to_smem (!%p962_p11), %s203_s7, 16, %s860_s13, [#allocation5]  }
  0x27   : > { %1172 = sst [smem:[#allocation15_spill]] %s1189_s10  ;;  %p74_p10 = scmp.ne.s32.totalorder %s846_s20, %s842_s19 }
  0x28   : > { %p75_p6 = scmp.eq.s32.totalorder %s858_s23, 0  ;;  %s62_s14 = ssub.s32 %s854_s22, %s1189_s10 }
  0x29   : > { %p630_p4 = scmp.lt.s32.totalorder %s858_s23, 2  ;;  %p65_p9 = scmp.eq.s32.totalorder %s62_s14, 0 }
  0x2a   : > { %p76_p13 = por %p75_p6, %p74_p10  ;;  %p982_p0 = por %p934_p2, %p74_p10 }
  0x2b   : > { %s987_s16 = sand.u32 1, %s846_s20   ;;  %s601_s25 = sshll.u32 %s854_s22, 8 }
  0x2c   : > { %s1173_s15 = scalar_select %p982_p0, 1, 0 }
  0x2d   : > { %s990_s17 = scalar_select %p65_p9, %s846_s20, %s67_s11  }
  0x2e   : > { %s1155_s24 = sshll.u32 %s987_s16, 4  ;;  %s1174_s1 = sld [smem:[#allocation17_spill]] }
  0x2f   : > { %s223_s27 = scalar_lea.vmem [#allocation6], %s1155_s24  ;;  %p1003_p2 = pnand %p630_p4, %p76_p13 }
  0x30   : > { %s233_s9 = sshll.u32 %s223_s27, 4  ;;  %s1010_s14 = scalar_lea.hbm %s1150_s2, %s601_s25  ;;  %s1001_s9 = int_to_ptr.vmem [resolvable:$true] %s233_s9 }
  0x31   : > { %s220_s30 = scalar_lea.sflag [#allocation3], %s987_s16  ;;  %p710_p12 = pneg %p1003_p2 }
  0x34   : > { %s997_s7 = scalar_lea.hbm %s1174_s1, %s601_s25  ;;  %s713_s0 = scalar_lea.hbm %s1174_s1, 512 }
  0x35   : > { %s708_s6 = scalar_lea.hbm %s997_s7, 256  ;;  %p714_p7 = scmp.lt.u32.totalorder %s997_s7, %s1174_s1 }
  0x36   : > { %p709_p11 = scmp.ne.s32.totalorder %s997_s7, %s708_s6  ;;  %p715_p10 = scmp.lt.u32.totalorder %s713_s0, %s708_s6 }
  0x37   : > { %p717_p4 = scmp.lt.u32.totalorder %s708_s6, %s997_s7 }
  0x38   : > { %p711_p3 = pnand %p710_p12, %p709_p11  ;;  %p716_p6 = por %p715_p10, %p714_p7 }
  0x3a   : > { %p712_p5 = pneg %p711_p3  ;;  %p718_p9 = por %p717_p4, %p716_p6 }
  0x3c   : > { %p719_p13 = pnand %p718_p9, %p712_p5 }
  0x3e   : > { %722 = shalt.err (!%p719_p13)
}
  0x3f   : > { %s723_s25 = scalar_lea.vmem %s1001_s9, 256  ;;  %s861_s24 = smov [#allocation6]  }
  0x40   : > { %p724_p11 = scmp.ne.s32.totalorder %s1001_s9, %s723_s25  ;;  %s728_s11 = sshll.u32 %s861_s24, 4  ;;  %s729_s11 = int_to_ptr.vmem [resolvable:$false] %s728_s11 }
  0x41   : > { %s730_s22 = scalar_lea.vmem %s729_s11, 512  ;;  %p731_p1 = scmp.lt.s32.totalorder %s1001_s9, %s729_s11 }
  0x42   : > { %p726_p3 = pnand %p724_p11, %p710_p12  ;;  %p732_p7 = scmp.lt.s32.totalorder %s730_s22, %s723_s25 }
  0x44   : > { %p727_p0 = pneg %p726_p3  ;;  %p733_p10 = por %p732_p7, %p731_p1 }
  0x46   : > { %p734_p6 = pnand %p733_p10, %p727_p0 }
  0x48   : > { %737 = shalt.err (!%p734_p6)
}
  0x49   : > { %621 = dma.hbm_to_vmem [thread:$0]  (!%p1003_p2), %s997_s7, 256, %s1001_s9, %s220_s30  }
  0x4a   : > { %s1176_s0 = sshll.u32 %s987_s16, 4  ;;  %s241_s6 = scalar_lea.sflag [#allocation8], %s987_s16 }
  0x4b   : > { %s244_s10 = scalar_lea.vmem [#allocation7], %s1176_s0  ;;  %s738_s27 = scalar_lea.hbm %s1010_s14, 256 }
  0x4c   : > { %s254_s13 = sshll.u32 %s244_s10, 4  ;;  %p739_p1 = scmp.ne.s32.totalorder %s1010_s14, %s738_s27  ;;  %s255_s13 = int_to_ptr.vmem [resolvable:$true] %s254_s13 }
  0x4d   : > { %s743_s11 = scalar_lea.hbm %s1150_s2, 512  ;;  %p744_p4 = scmp.lt.u32.totalorder %s1010_s14, %s1150_s2 }
  0x4e   : > { %p741_p0 = pnand %p739_p1, %p710_p12  ;;  %p745_p9 = scmp.lt.u32.totalorder %s743_s11, %s738_s27 }
  0x4f   : > { %p747_p11 = scmp.lt.u32.totalorder %s738_s27, %s1010_s14 }
  0x50   : > { %p742_p5 = pneg %p741_p0  ;;  %p746_p13 = por %p745_p9, %p744_p4 }
  0x52   : > { %p748_p3 = por %p747_p11, %p746_p13 }
  0x54   : > { %p749_p7 = pnand %p748_p3, %p742_p5 }
  0x56   : > { %752 = shalt.err (!%p749_p7)
}
  0x57   : > { %s753_s16 = scalar_lea.vmem %s255_s13, 256  ;;  %s862_s7 = smov [#allocation7]  }
  0x58   : > { %p754_p10 = scmp.ne.s32.totalorder %s255_s13, %s753_s16  ;;  %s758_s9 = sshll.u32 %s862_s7, 4  ;;  %s759_s9 = int_to_ptr.vmem [resolvable:$false] %s758_s9 }
  0x59   : > { %s760_s30 = scalar_lea.vmem %s759_s9, 512  ;;  %p761_p0 = scmp.lt.s32.totalorder %s255_s13, %s759_s9 }
  0x5a   : > { %p756_p6 = pnand %p754_p10, %p710_p12  ;;  %p762_p8 = scmp.lt.s32.totalorder %s760_s30, %s753_s16 }
  0x5c   : > { %p757_p1 = pneg %p756_p6  ;;  %p763_p4 = por %p762_p8, %p761_p0 }
  0x5e   : > { %p764_p9 = pnand %p763_p4, %p757_p1 }
  0x60   : > { %767 = shalt.err (!%p764_p9)
}
  0x61   : > { %624 = dma.hbm_to_vmem [thread:$0]  (!%p1003_p2), %s1010_s14, 256, %s255_s13, %s241_s6  }
  0x62   : > { %p1177_p5 = scmp.ne.s32.totalorder %s1170_s8, 0 }
  0x63   : > { %p1178_p13 = scmp.ne.s32.totalorder (!%p1177_p5), %s1165_s26, 0 }
  0x64   : > { %263 = sbr.rel (%p1177_p5) target bundleno = 382 (0x17e), region = 40 }
  0x6b   : > { %821 = dma.done.wait (%p1178_p13), [#allocation5], 16  }
  0x6c   : > { %823 = vsyncadd (%p1178_p13), [#allocation5], 4294967280  ;;  %s1067_s1 = sand.u32 1, %s842_s19   ;;  %p1179_p8 = scmp.ne.s32.totalorder %s1167_s28, 0 }
  0x6d   : > { %s1070_s0 = sshll.u32 %s1067_s1, 4  ;;  %s270_s12 = scalar_lea.sflag [#allocation3], %s1067_s1 }
  0x6e   : > { %s273_s14 = scalar_lea.vmem [#allocation6], %s1070_s0 }
  0x6f   : > { %825 = dma.done.wait (%p1179_p8), %s270_s12, 256  }
  0x70   : > { %827 = vsyncadd (%p1179_p8), %s270_s12, 4294967040  ;;  %s279_s26 = scalar_lea.sflag [#allocation8], %s1067_s1  ;;  %s282_s8 = scalar_lea.vmem [#allocation7], %s1070_s0 }
  0x71   : > { %829 = dma.done.wait (%p1179_p8), %s279_s26, 256  }
  0x72   : > { %831 = vsyncadd (%p1179_p8), %s279_s26, 4294967040 }
  0x73   : > { %287 = sfence }
  0x74   : > { %v326_v0 = vld [vmem:[%s282_s8 + $0x8] sm:$0xff]  ;;  %v325_v1 = vld [vmem:[%s282_s8] sm:$0xff]  ;;  %vm334_vm0 = vcmask 64512   ;;  %v863_v3 = vmov 0.0   ;;  %v864_v5 = vmov 0   ;;  %s318_s28 = sld [smem:[#allocation2]] }
  0x75   : > { %v327_v2 = vld [vmem:[%s1151_s3] sm:$0xff]  ;;  %338 = vmatprep.subr.mxu0 %v326_v0  ;;  %402 = vmatprep.mubr.f32.mxu0 %v863_v3  ;;  %s591_s25 = sld [smem:[#allocation2 + $0x1]]  ;;  %s592_s24 = sld [smem:[#allocation2 + $0x2]]  ;;  %v324_v23 = vld [vmem:[%s273_s14 + $0x8] sm:$0xff] }
  0x76   : > { %v328_v4 = vld [vmem:[%s1152_s4] sm:$0xff]  ;;  %339 = vmatpush1.msra.mxu0 %v325_v1  ;;  %684 = vset.pattern.permute.xlu0 %v864_v5  ;;  %s603_s16 = sshll.u32 %s850_s21, 8  ;;  %s314_s7 = scalar_lea.vmem [#allocation9], %s1070_s0 }
  0x77   : > { %593 = vmatmul.mubr.msk.f32.vlgmr.msra.gmra.mrb[0].mxu0 %vm334_vm0, %v327_v2  ;;  %331 = vperm.xlu0 %684, %v328_v4   ;;  %v323_v19 = vld [vmem:[%s273_s14] sm:$0xff]  ;;  %s453_s9 = sshll.u32 %s314_s7, 4  ;;  %s1099_s26 = scalar_lea.hbm %s1153_s5, %s603_s16  ;;  %s1101_s9 = int_to_ptr.vmem [resolvable:$true] %s453_s9 }
  0x78   : > { %s437_s14 = scalar_lea.sflag [#allocation4], %s1067_s1  ;;  %s768_s8 = scalar_lea.vmem %s1101_s9, 256 }
  0x79   : > { %p769_p2 = scmp.ne.s32.totalorder %s1101_s9, %s768_s8  ;;  %p1180_p12 = scmp.ne.s32.totalorder %s1173_s15, 0 }
  0x7a   : > { %s865_s21 = smov [#allocation9]  }
  0x7b   : > { %s321_s11 = sadd.f32 %s591_s25, %s318_s28  ;;  %v424_v17 = vstv %s592_s24  ;;  %v427_v21 = vstv %s591_s25  ;;  %p770_p11 = pnand %p769_p2, %p1180_p12 }
  0x7c   : > { %s772_s0 = sshll.u32 %s865_s21, 4  ;;  %s773_s0 = int_to_ptr.vmem [resolvable:$false] %s772_s0 }
  0x7d   : > { %s322_s22 = sadd.f32 %s592_s24, %s321_s11  ;;  %p771_p3 = pneg %p770_p11 }
  0x7e   : > { %s774_s10 = scalar_lea.vmem %s773_s0, 512  ;;  %p775_p7 = scmp.lt.s32.totalorder %s1101_s9, %s773_s0 }
  0x7f   : > { %v421_v20 = vstv %s322_s22  ;;  %p776_p10 = scmp.lt.s32.totalorder %s774_s10, %s768_s8 }
  0x80   : > { %v422_v26 = vmul.f32 %v421_v20, %v323_v19  ;;  %v423_v28 = vmul.f32 %v421_v20, %v324_v23 }
  0x81   : > { %p777_p6 = por %p776_p10, %p775_p7 }
  0x83   : > { %p778_p1 = pnand %p777_p6, %p771_p3 }
  0xf6   : > { %v332_v6 = vpop.permute.xlu0 %331 }
 0x14a   : > { %v404_v7 = vpop.f32.mrb[0].mxu0 }
 0x14b   : > { %v405_v8 = vadd.f32 %v404_v7, %v332_v6  ;;  %v406_v9 = vpop.f32.mrb[1].mxu0 }
 0x14c   : > { %v407_v10 = vadd.f32 %v406_v9, %v332_v6 }
 0x14d   : > { %v594_v11 = vmul.f32 -1.442695, %v405_v8 }
 0x14e   : > { %v595_v12 = vmul.f32 -1.442695, %v407_v10 }
 0x14f   : > { %685 = vpow2.f32 %v594_v11 }
 0x150   : > { %687 = vpow2.f32 %v595_v12 }
 0x159   : > { %v686_v13 = vpop.eup %685 }
 0x15a   : > { %v688_v14 = vpop.eup %687  ;;  %v415_v15 = vadd.f32 1.0, %v686_v13 }
 0x15b   : > { %v416_v16 = vadd.f32 1.0, %v688_v14 }
 0x15c   : > { %689 = vrcp.f32 %v415_v15 }
 0x15d   : > { %691 = vrcp.f32 %v416_v16 }
 0x166   : > { %v690_v18 = vpop.eup %689 }
 0x167   : > { %v692_v22 = vpop.eup %691  ;;  %v425_v24 = vmul.f32 %v690_v18, %v424_v17 }
 0x168   : > { %v426_v25 = vmul.f32 %v692_v22, %v424_v17 }
 0x169   : > { %v428_v27 = vadd.f32 %v427_v21, %v425_v24 }
 0x16a   : > { %v429_v29 = vadd.f32 %v427_v21, %v426_v25 }
 0x16b   : > { %v430_v30 = vmul.f32 %v428_v27, %v325_v1 }
 0x16c   : > { %v431_v31 = vmul.f32 %v429_v29, %v326_v0 }
 0x16d   : > { %v432_v32 = vadd.f32 %v430_v30, %v422_v26 }
 0x16e   : > { %v433_v33 = vadd.f32 %v431_v31, %v423_v28 }
 0x16f   : > { %434 = vst [vmem:[%s314_s7] sm:$0xff] %v432_v32 }
 0x170   : > { %435 = vst [vmem:[%s314_s7 + $0x8] sm:$0xff] %v433_v33 }
 0x171   : > { %781 = shalt.err (!%p778_p1)
}
 0x172   : > { %s782_s1 = scalar_lea.hbm %s1099_s26, 256  ;;  %s786_s27 = scalar_lea.hbm %s1153_s5, 512 }
 0x173   : > { %p783_p0 = scmp.ne.s32.totalorder %s1099_s26, %s782_s1  ;;  %p787_p5 = scmp.lt.u32.totalorder %s1099_s26, %s1153_s5 }
 0x174   : > { %p788_p13 = scmp.lt.u32.totalorder %s786_s27, %s782_s1  ;;  %p790_p2 = scmp.lt.u32.totalorder %s782_s1, %s1099_s26 }
 0x175   : > { %p784_p4 = pnand %p783_p0, %p1180_p12 }
 0x176   : > { %p789_p8 = por %p788_p13, %p787_p5 }
 0x177   : > { %p785_p9 = pneg %p784_p4 }
 0x178   : > { %p791_p11 = por %p790_p2, %p789_p8 }
 0x17a   : > { %p792_p3 = pnand %p791_p11, %p785_p9 }
 0x17c   : > { %795 = shalt.err (!%p792_p3)
}
 0x17d   : > { %612 = dma.vmem_to_hbm [thread:$0]  (%p1180_p12), %s1101_s9, 256, %s1099_s26, %s437_s14  }
 0x17e PF: > { %s465_s24 = sand.u32 1, %s838_s18   ;;  %p1181_p7 = scmp.ne.s32.totalorder %s1168_s29, 0 }
 0x17f   : > { %p1182_p10 = scmp.ge.s32.totalorder %s858_s23, 2  ;;  %s466_s11 = scalar_lea.sflag [#allocation4], %s465_s24 }
 0x181   : > { %p626_p6 = pnand %p1182_p10, %p1181_p7 }
 0x183   : > { %833 = dma.done.wait (!%p626_p6), %s466_s11, 256  }
 0x184   : > { %835 = vsyncadd (!%p626_p6), %s466_s11, 4294967040  ;;  %s25_s23 = sadd.s32 1, %s858_s23   ;;  %s1183_s21 = sld [smem:[#allocation14_spill]] }
 0x185   : > { %p22_p1 = scmp.ge.s32.totalorder %s25_s23, 4   ;;  %s1184_s22 = sld [smem:[#allocation15_spill]] }
 0x186   : > { %s1185_s18 = smov %s842_s19  ;;  %s1186_s19 = smov %s846_s20 }
 0x187   : > { %s1187_s20 = smov %s990_s17  ;;  %24 = sbr.rel (!%p22_p1) target bundleno = 12 (0xc), region = 103 }
 0x18e   :  { %471 = vsyncpa [#allocation3], 1 }
 0x18f   :  { %473 = vsyncpa [#allocation3 + $0x1], 1 }
 0x190   :  { %474 = vsyncpa [#allocation8], 1 }
 0x191   :  { %476 = vsyncpa [#allocation8 + $0x1], 1 }
 0x192   :  { %477 = vsyncpa [#allocation4], 1 }
 0x193   :  { %479 = vsyncpa [#allocation4 + $0x1], 1 }
 0x194   :  { %480 = vsyncpa [#allocation5], 1 }
 0x195   :  { %482 = vsyncpa [#allocation5 + $0x1], 1 }

</bundles_post_ra>
